<compile_context>
chip_gen: v7x
topology: tpu7x:2x2x1
jax: 0.10.0
libtpu: 0.0.40
codegen_flags: <defaults>
</compile_context>

<pallas_src>
import math

import jax
import jax.numpy as jnp
from jax.experimental import pallas as pl
from jax.experimental.pallas import tpu as pltpu


def sc_attention_kernel(pro_ref, nbr_ref, a_self_ref, a_nbr_ref, out_ref):
    # pro_ref    : (TN, H)
    # nbr_ref    : (TN, K, H)
    # a_self_ref : (1, H)    attn[:H] as a lane-major row
    # a_nbr_ref  : (1, H)    attn[H:] as a lane-major row
    # out_ref    : (TN, H)
    pro = pro_ref[...]                                   # (TN, H)
    nbr = nbr_ref[...]                                   # (TN, K, H)
    a_self = a_self_ref[...]                             # (1, H)
    a_nbr = a_nbr_ref[...]                               # (1, H)

    # attention logits: cat([pro, nbr], -1) @ attn == pro.a_self + nbr.a_nbr
    # VPU broadcast-multiply + lane reduce (no width-1 MXU matmul, no reshape)
    s_self = jnp.sum(pro * a_self, axis=-1, keepdims=True)          # (TN, 1)
    s_nbr = jnp.sum(nbr * a_nbr, axis=-1)                           # (TN, K)
    logits = s_self + s_nbr                                          # (TN, K)

    # leaky_relu (default negative_slope = 0.01)
    logits = jnp.where(logits >= 0, logits, 0.01 * logits)

    # numerically-stable softmax over the neighbor axis
    logits = logits - jnp.max(logits, axis=-1, keepdims=True)
    e = jnp.exp(logits)
    denom = jnp.sum(e, axis=-1, keepdims=True)                       # (TN, 1)
    w = e * pl.reciprocal(denom, approx=True)                        # (TN, K)

    # weighted sum of neighbor features
    out = jnp.sum(nbr * w[:, :, None], axis=1)                       # (TN, H)
    out_ref[...] = out.astype(out_ref.dtype)


def _round_up(x, m):
    return ((x + m - 1) // m) * m


def sc_attention(pro_feature, neibor_feature, now_neibor_list, attn, *, tn=1024):
    """pro_feature (N,H) f32, neibor_feature (M,H) f32, now_neibor_list (N,K) i32,
    attn (2H,1) f32  ->  (N,H) f32."""
    N, H = pro_feature.shape
    K = now_neibor_list.shape[1]

    # F.embedding gather (plain JAX glue, see TODO at top of file).
    nbr_feat = neibor_feature[now_neibor_list]           # (N, K, H)

    # attn halves as lane-major rows (one partially-filled vreg each instead
    # of a lane-sparse (2H, 1) column).
    a_self = attn[:H, 0][None, :]                        # (1, H)
    a_nbr = attn[H:, 0][None, :]                         # (1, H)

    # Row tile: as large as requested, clamped to the (padded) problem size,
    # kept a multiple of 8 sublanes.  Pad N so grid = cdiv works for any N;
    # zero-padded rows are harmless (uniform softmax of zeros -> zero output)
    # and are sliced off at the end.
    tn_eff = max(8, min(_round_up(tn, 8), _round_up(N, 8)))
    padded_n = _round_up(N, tn_eff)
    if padded_n != N:
        pad = padded_n - N
        pro_p = jnp.pad(pro_feature, ((0, pad), (0, 0)))
        nbr_p = jnp.pad(nbr_feat, ((0, pad), (0, 0), (0, 0)))
    else:
        pro_p, nbr_p = pro_feature, nbr_feat

    grid = (padded_n // tn_eff,)

    out = pl.pallas_call(
        sc_attention_kernel,
        out_shape=jax.ShapeDtypeStruct((padded_n, H), pro_feature.dtype),
        grid_spec=pltpu.PrefetchScalarGridSpec(
            num_scalar_prefetch=0,
            grid=grid,
            in_specs=[
                pl.BlockSpec((tn_eff, H), lambda i: (i, 0)),
                pl.BlockSpec((tn_eff, K, H), lambda i: (i, 0, 0)),
                pl.BlockSpec((1, H), lambda i: (0, 0)),
                pl.BlockSpec((1, H), lambda i: (0, 0)),
            ],
            out_specs=pl.BlockSpec((tn_eff, H), lambda i: (i, 0)),
        ),
        compiler_params=pltpu.CompilerParams(
            dimension_semantics=("parallel",),
            vmem_limit_bytes=64 * 1024 * 1024,
        ),
    )(pro_p, nbr_p, a_self, a_nbr)
    return out[:N]


def sc_attention_ref(pro_feature, neibor_feature, now_neibor_list, attn):
    """Pure-JAX reference mirroring the PyTorch forward."""
    nbr = neibor_feature[now_neibor_list]                         # (N,K,H)
    now = jnp.broadcast_to(pro_feature[:, None, :], nbr.shape)    # (N,K,H)
    allf = jnp.concatenate([now, nbr], axis=-1)                   # (N,K,2H)
    s = allf @ attn                                               # (N,K,1)
    s = jnp.where(s >= 0, s, 0.01 * s)
    w = jax.nn.softmax(s, axis=1)
    return jnp.sum(nbr * w, axis=1)


if __name__ == "__main__":
    key = jax.random.PRNGKey(0)
    N, K, H, M = 16, 8, 32, 64          # nodes, neighbors-per-node, hidden, table rows
    k1, k2, k3, k4 = jax.random.split(key, 4)

    pro_feature = jax.random.normal(k1, (N, H), dtype=jnp.float32)
    neibor_feature = jax.random.normal(k2, (M, H), dtype=jnp.float32)
    now_neibor_list = jax.random.randint(k3, (N, K), 0, M, dtype=jnp.int32)

    # deterministic xavier_uniform init of attn (2H, 1), gain=1.414
    fan_in, fan_out = 1, 2 * H
    bound = 1.414 * math.sqrt(6.0 / (fan_in + fan_out))
    attn = jax.random.uniform(k4, (2 * H, 1), minval=-bound, maxval=bound,
                              dtype=jnp.float32)

    out = sc_attention(pro_feature, neibor_feature, now_neibor_list, attn)
    out = jax.block_until_ready(out)

    ref = sc_attention_ref(pro_feature, neibor_feature, now_neibor_list, attn)
    # Tolerance accounts for the approx=True (EUP) reciprocal in the softmax.
    if not jnp.allclose(out, ref, atol=2e-3, rtol=2e-3):
        raise AssertionError("Pallas kernel does not match reference")

    print("KERNEL_OK")
</pallas_src>

<mosaic_0001>
module attributes {stable_mosaic.version = 11 : i64} {
  func.func @sc_attention_kernel(%arg0: i32, %arg1: memref<16x32xf32, #tpu.memory_space<vmem>>, %arg2: memref<16x8x32xf32, #tpu.memory_space<vmem>>, %arg3: memref<1x32xf32, #tpu.memory_space<vmem>>, %arg4: memref<1x32xf32, #tpu.memory_space<vmem>>, %arg5: memref<16x32xf32, #tpu.memory_space<vmem>>) attributes {dimension_semantics = [#tpu.dimension_semantics<parallel>], iteration_bounds = array<i64: 1>, scalar_prefetch = 0 : i64, scratch_operands = 0 : i64, tpu.core_type = #tpu.core_type<tc>, window_params = [{transform_indices = @transform_0, window_bounds = array<i64: 16, 32>}, {transform_indices = @transform_1, window_bounds = array<i64: 16, 8, 32>}, {pipeline_mode = #tpu.pipeline_mode<synchronous>, transform_indices = @transform_2, window_bounds = array<i64: 1, 32>}, {pipeline_mode = #tpu.pipeline_mode<synchronous>, transform_indices = @transform_3, window_bounds = array<i64: 1, 32>}, {transform_indices = @transform_4, window_bounds = array<i64: 16, 32>}]} {
    %c0 = arith.constant 0 : index
    %c0_0 = arith.constant 0 : index
    %0 = vector.load %arg1[%c0, %c0_0] : memref<16x32xf32, #tpu.memory_space<vmem>>, vector<16x32xf32>
    %c0_1 = arith.constant 0 : index
    %c0_2 = arith.constant 0 : index
    %c0_3 = arith.constant 0 : index
    %1 = vector.load %arg2[%c0_1, %c0_2, %c0_3] : memref<16x8x32xf32, #tpu.memory_space<vmem>>, vector<16x8x32xf32>
    %c0_4 = arith.constant 0 : index
    %c0_5 = arith.constant 0 : index
    %2 = vector.load %arg3[%c0_4, %c0_5] : memref<1x32xf32, #tpu.memory_space<vmem>>, vector<1x32xf32>
    %c0_6 = arith.constant 0 : index
    %c0_7 = arith.constant 0 : index
    %3 = vector.load %arg4[%c0_6, %c0_7] : memref<1x32xf32, #tpu.memory_space<vmem>>, vector<1x32xf32>
    %4 = vector.broadcast %2 : vector<1x32xf32> to vector<16x32xf32>
    %5 = arith.mulf %0, %4 : vector<16x32xf32>
    %cst = arith.constant dense<0.000000e+00> : vector<16xf32>
    %6 = vector.multi_reduction <add>, %5, %cst [1] : vector<16x32xf32> to vector<16xf32>
    %7 = vector.shape_cast %6 : vector<16xf32> to vector<16x1xf32>
    %8 = vector.shape_cast %3 : vector<1x32xf32> to vector<1x1x32xf32>
    %9 = vector.broadcast %8 : vector<1x1x32xf32> to vector<16x8x32xf32>
    %10 = arith.mulf %1, %9 : vector<16x8x32xf32>
    %cst_8 = arith.constant dense<0.000000e+00> : vector<16x8xf32>
    %11 = vector.multi_reduction <add>, %10, %cst_8 [2] : vector<16x8x32xf32> to vector<16x8xf32>
    %12 = vector.broadcast %7 : vector<16x1xf32> to vector<16x8xf32>
    %13 = arith.addf %12, %11 : vector<16x8xf32>
    %cst_9 = arith.constant 0.000000e+00 : f32
    %14 = vector.broadcast %cst_9 : f32 to vector<16x8xf32>
    %15 = arith.cmpf oge, %13, %14 : vector<16x8xf32>
    %cst_10 = arith.constant 0.00999999977 : f32
    %16 = vector.broadcast %cst_10 : f32 to vector<16x8xf32>
    %17 = arith.mulf %16, %13 : vector<16x8xf32>
    %18 = arith.select %15, %13, %17 : vector<16x8xi1>, vector<16x8xf32>
    %cst_11 = arith.constant dense<0xFF800000> : vector<16xf32>
    %19 = vector.multi_reduction <maximumf>, %18, %cst_11 [1] : vector<16x8xf32> to vector<16xf32>
    %20 = vector.shape_cast %19 : vector<16xf32> to vector<16x1xf32>
    %21 = vector.broadcast %20 : vector<16x1xf32> to vector<16x8xf32>
    %22 = arith.subf %18, %21 : vector<16x8xf32>
    %23 = math.exp %22 : vector<16x8xf32>
    %cst_12 = arith.constant dense<0.000000e+00> : vector<16xf32>
    %24 = vector.multi_reduction <add>, %23, %cst_12 [1] : vector<16x8xf32> to vector<16xf32>
    %25 = vector.shape_cast %24 : vector<16xf32> to vector<16x1xf32>
    %26 = tpu.reciprocal %25 {approx = true} : vector<16x1xf32> -> vector<16x1xf32>
    %27 = vector.broadcast %26 : vector<16x1xf32> to vector<16x8xf32>
    %28 = arith.mulf %23, %27 : vector<16x8xf32>
    %29 = vector.shape_cast %28 : vector<16x8xf32> to vector<16x8x1xf32>
    %30 = vector.broadcast %29 : vector<16x8x1xf32> to vector<16x8x32xf32>
    %31 = arith.mulf %1, %30 : vector<16x8x32xf32>
    %cst_13 = arith.constant dense<0.000000e+00> : vector<16x32xf32>
    %32 = vector.multi_reduction <add>, %31, %cst_13 [1] : vector<16x8x32xf32> to vector<16x32xf32>
    %c0_14 = arith.constant 0 : index
    %c0_15 = arith.constant 0 : index
    %33 = vector.load %arg5[%c0_14, %c0_15] : memref<16x32xf32, #tpu.memory_space<vmem>>, vector<16x32xf32>
    tpu.vector_store %arg5[%c0_14, %c0_15], %32 {strides = array<i32>} : memref<16x32xf32, #tpu.memory_space<vmem>>, vector<16x32xf32>,
    return
  }
  func.func @transform_0(%arg0: i32) -> (i32, i32) {
    %c0_i32 = arith.constant 0 : i32
    %c0_i32_0 = arith.constant 0 : i32
    return %arg0, %c0_i32 : i32, i32
  }
  func.func @transform_1(%arg0: i32) -> (i32, i32, i32) {
    %c0_i32 = arith.constant 0 : i32
    %c0_i32_0 = arith.constant 0 : i32
    %c0_i32_1 = arith.constant 0 : i32
    return %arg0, %c0_i32, %c0_i32_0 : i32, i32, i32
  }
  func.func @transform_2(%arg0: i32) -> (i32, i32) {
    %c0_i32 = arith.constant 0 : i32
    %c0_i32_0 = arith.constant 0 : i32
    %c0_i32_1 = arith.constant 0 : i32
    return %c0_i32, %c0_i32_0 : i32, i32
  }
  func.func @transform_3(%arg0: i32) -> (i32, i32) {
    %c0_i32 = arith.constant 0 : i32
    %c0_i32_0 = arith.constant 0 : i32
    %c0_i32_1 = arith.constant 0 : i32
    return %c0_i32, %c0_i32_0 : i32, i32
  }
  func.func @transform_4(%arg0: i32) -> (i32, i32) {
    %c0_i32 = arith.constant 0 : i32
    %c0_i32_0 = arith.constant 0 : i32
    return %arg0, %c0_i32 : i32, i32
  }
}

</mosaic_0001>

<bundles_post_ra>
// kernel: tpu_custom_call.1
= control target key start
LH: loop header
LB: loop body
LE: loop exit
PB: predicated region body
PF: predicated region fallthrough
CT: control target
= control target key end

     0   :  { %9 = vsyncpa [#allocation3], 0  ;;  %s993_s0 = inlined_call_operand.hbm [shape: f32[16,32], index: 0, kind: input, shape index: {}]   ;;  %s994_s1 = inlined_call_operand.hbm [shape: f32[16,8,32], index: 1, kind: input, shape index: {}]   ;;  %s995_s2 = inlined_call_operand.hbm [shape: f32[1,32], index: 2, kind: input, shape index: {}]   ;;  %s996_s3 = inlined_call_operand.hbm [shape: f32[1,32], index: 3, kind: input, shape index: {}]   ;;  %s997_s4 = inlined_call_operand.hbm [shape: f32[16,32], index: 4, kind: output, shape index: {}]  }
   0x1   :  { %10 = vsyncpa [#allocation6], 0 }
   0x2   :  { %11 = vsyncpa [#allocation9], 0 }
   0x3   :  { %12 = vsyncpa [#allocation4], 0  ;;  %s738_s15 = smov [#allocation5]   ;;  %s739_s17 = smov [#allocation2]  }
   0x4   :  { %s30_s16 = sshll.u32 %s738_s15, 4  ;;  %s18_s18 = sshll.u32 %s739_s17, 4  ;;  %s31_s16 = int_to_ptr.vmem [resolvable:$true] %s30_s16  ;;  %s770_s18 = int_to_ptr.vmem [resolvable:$true] %s18_s18 }
   0x5   :  { %s620_s21 = scalar_lea.hbm %s994_s1, 2048 }
   0x6   :  { %p621_p0 = scmp.ne.s32.totalorder %s994_s1, %s620_s21  ;;  %p624_p1 = scmp.lt.u32.totalorder %s620_s21, %s994_s1 }
   0x8   :  { %p626_p2 = pnand %p624_p1, %p621_p0 }
   0xa   :  { %629 = shalt.err (!%p626_p2)
}
   0xb   :  { %s630_s26 = scalar_lea.vmem %s31_s16, 2048  ;;  %p635_p4 = scmp.lt.s32.totalorder %s31_s16, %s31_s16 }
   0xc   :  { %p631_p3 = scmp.ne.s32.totalorder %s31_s16, %s630_s26  ;;  %p636_p5 = scmp.lt.s32.totalorder %s630_s26, %s630_s26 }
   0xe   :  { %p637_p6 = por %p636_p5, %p635_p4 }
  0x10   :  { %p638_p7 = pnand %p637_p6, %p631_p3 }
  0x12   :  { %641 = shalt.err (!%p638_p7)
}
  0x13   :  { %s740_s27 = smov 128   ;;  %s741_s28 = smov 8  }
  0x14   :  { %36 = dma.hbm_to_vmem [thread:$0]  %s994_s1, 2048, %s31_s16, [#allocation6], %s740_s27, %s740_s27, %s741_s28  }
  0x15   :  { %s642_s7 = scalar_lea.hbm %s993_s0, 256 }
  0x16   :  { %p643_p8 = scmp.ne.s32.totalorder %s993_s0, %s642_s7  ;;  %p646_p9 = scmp.lt.u32.totalorder %s642_s7, %s993_s0 }
  0x18   :  { %p648_p10 = pnand %p646_p9, %p643_p8 }
  0x1a   :  { %651 = shalt.err (!%p648_p10)
}
  0x1b   :  { %s652_s12 = scalar_lea.vmem %s770_s18, 256  ;;  %p657_p12 = scmp.lt.s32.totalorder %s770_s18, %s770_s18 }
  0x1c   :  { %p653_p11 = scmp.ne.s32.totalorder %s770_s18, %s652_s12  ;;  %p658_p13 = scmp.lt.s32.totalorder %s652_s12, %s652_s12 }
  0x1e   :  { %p659_p0 = por %p658_p13, %p657_p12 }
  0x20   :  { %p660_p1 = pnand %p659_p0, %p653_p11 }
  0x22   :  { %663 = shalt.err (!%p660_p1)
}
  0x23   :  { %24 = dma.hbm_to_vmem [thread:$0]  %s993_s0, 256, %s770_s18, [#allocation3], %s740_s27, %s740_s27, %s741_s28  }
  0x24   :  { %s742_s14 = smov [#allocation7]   ;;  %s743_s16 = smov [#allocation8]  }
  0x25   :  { %s43_s15 = sshll.u32 %s742_s14, 4  ;;  %s53_s17 = sshll.u32 %s743_s16, 4  ;;  %s44_s15 = int_to_ptr.vmem [resolvable:$true] %s43_s15  ;;  %s54_s17 = int_to_ptr.vmem [resolvable:$true] %s53_s17 }
  0x26   :  { %s664_s21 = scalar_lea.hbm %s995_s2, 16 }
  0x27   :  { %p665_p2 = scmp.ne.s32.totalorder %s995_s2, %s664_s21  ;;  %p668_p3 = scmp.lt.u32.totalorder %s664_s21, %s995_s2 }
  0x29   :  { %p670_p4 = pnand %p668_p3, %p665_p2 }
  0x2b   :  { %673 = shalt.err (!%p670_p4)
}
  0x2c   :  { %s674_s0 = scalar_lea.vmem %s44_s15, 16  ;;  %s678_s18 = scalar_lea.vmem %s44_s15, 32 }
  0x2d   :  { %p675_p5 = scmp.ne.s32.totalorder %s44_s15, %s674_s0  ;;  %p679_p6 = scmp.lt.s32.totalorder %s44_s15, %s44_s15 }
  0x2e   :  { %p680_p7 = scmp.lt.s32.totalorder %s678_s18, %s674_s0 }
  0x30   :  { %p681_p8 = por %p680_p7, %p679_p6 }
  0x32   :  { %p682_p9 = pnand %p681_p8, %p675_p5 }
  0x34   :  { %685 = shalt.err (!%p682_p9)
}
  0x35   :  { %46 = dma.hbm_to_vmem [thread:$0]  %s995_s2, 16, %s44_s15, [#allocation6]  }
  0x36   :  { %s686_s6 = scalar_lea.hbm %s996_s3, 16 }
  0x37   :  { %p687_p10 = scmp.ne.s32.totalorder %s996_s3, %s686_s6  ;;  %p690_p11 = scmp.lt.u32.totalorder %s686_s6, %s996_s3 }
  0x39   :  { %p692_p12 = pnand %p690_p11, %p687_p10 }
  0x3b   :  { %695 = shalt.err (!%p692_p12)
}
  0x3c   :  { %s696_s11 = scalar_lea.vmem %s54_s17, 16  ;;  %s700_s12 = scalar_lea.vmem %s54_s17, 32 }
  0x3d   :  { %p697_p13 = scmp.ne.s32.totalorder %s54_s17, %s696_s11  ;;  %p701_p0 = scmp.lt.s32.totalorder %s54_s17, %s54_s17 }
  0x3e   :  { %p702_p1 = scmp.lt.s32.totalorder %s700_s12, %s696_s11 }
  0x40   :  { %p703_p2 = por %p702_p1, %p701_p0 }
  0x42   :  { %p704_p3 = pnand %p703_p2, %p697_p13 }
  0x44   :  { %707 = shalt.err (!%p704_p3)
}
  0x45   :  { %56 = dma.hbm_to_vmem [thread:$0]  %s996_s3, 16, %s54_s17, [#allocation9]  }
  0x46   :  { %730 = dma.done.wait [#allocation3], 256  }
  0x47   :  { %731 = vsyncadd [#allocation3], 4294967040 }
  0x48   :  { %732 = dma.done.wait [#allocation6], 2064  }
  0x49   :  { %733 = vsyncadd [#allocation6], 4294965232 }
  0x4a   :  { %734 = dma.done.wait [#allocation9], 16  }
  0x4b   :  { %735 = vsyncadd [#allocation9], 4294967280  ;;  %v831_v0 = vld [vmem:[#allocation5 + $0x40] sm:$0xff]  ;;  %vm97_vm0 = vcmask 261120   ;;  %v837_v5 = vld [vmem:[#allocation5 + $0x48] sm:$0xff]  ;;  %v190_v62 = vlaneseq  ;;  %vm256_vm1 = vcmask 1041409  }
  0x4c   :  { %v604_v1 = vld [vmem:[#allocation8] ss:$0 sm:$0xff]  ;;  %v839_v6 = vld [vmem:[#allocation5 + $0x8] sm:$0xff]  ;;  %v843_v9 = vld [vmem:[#allocation5 + $0x50] sm:$0xff]  ;;  %vm258_vm2 = vcmask 1042434   ;;  %vm260_vm3 = vcmask 1043459  }
  0x4d   :  { %v833_v2 = vld [vmem:[#allocation5] sm:$0xff]  ;;  %v118_v3 = vmul.f32 %v604_v1, %v831_v0  ;;  %v119_v7 = vmul.f32 %v604_v1, %v837_v5  ;;  %v111_v8 = vmul.f32 %v604_v1, %v839_v6  ;;  %v845_v10 = vld [vmem:[#allocation5 + $0x10] sm:$0xff]  ;;  %v120_v15 = vmul.f32 %v604_v1, %v843_v9  ;;  %v853_v17 = vld [vmem:[#allocation5 + $0x58] sm:$0xff]  ;;  %s744_s3 = smov [#allocation10]  }
  0x4e   :  { %v110_v4 = vmul.f32 %v604_v1, %v833_v2  ;;  %v112_v16 = vmul.f32 %v604_v1, %v845_v10  ;;  %v855_v18 = vld [vmem:[#allocation5 + $0x18] sm:$0xff]  ;;  %v121_v21 = vmul.f32 %v604_v1, %v853_v17  ;;  %v861_v23 = vld [vmem:[#allocation5 + $0x60] sm:$0xff]  ;;  %v869_v29 = vld [vmem:[#allocation5 + $0x68] sm:$0xff]  ;;  %vm262_vm4 = vcmask 1044484   ;;  %s589_s13 = sshll.u32 %s744_s3, 4  ;;  %s590_s13 = int_to_ptr.vmem [resolvable:$true] %s589_s13 }
  0x4f   :  { %v150_v11 = vsel %vm97_vm0, %v118_v3, 0.0  ;;  %v153_v13 = vsel %vm97_vm0, %v119_v7, 0.0  ;;  %v129_v14 = vsel %vm97_vm0, %v111_v8, 0.0  ;;  %v156_v19 = vsel %vm97_vm0, %v120_v15, 0.0  ;;  %v863_v24 = vld [vmem:[#allocation5 + $0x20] sm:$0xff]  ;;  %v871_v30 = vld [vmem:[#allocation5 + $0x28] sm:$0xff]  ;;  %p713_p5 = scmp.lt.s32.totalorder %s590_s13, %s590_s13 }
  0x50   :  { %v126_v12 = vsel %vm97_vm0, %v110_v4, 0.0  ;;  %151 = vadd.xlane.f32.xlu1 %v150_v11  ;;  %v132_v20 = vsel %vm97_vm0, %v112_v16, 0.0  ;;  %v113_v22 = vmul.f32 %v604_v1, %v855_v18  ;;  %v159_v25 = vsel %vm97_vm0, %v121_v21, 0.0  ;;  %v877_v35 = vld [vmem:[#allocation5 + $0x70] sm:$0xff]  ;;  %v885_v41 = vld [vmem:[#allocation5 + $0x78] sm:$0xff]  ;;  %s708_s14 = scalar_lea.vmem %s590_s13, 256 }
  0x51   :  { %127 = vadd.xlane.f32.xlu0 %v126_v12  ;;  %v122_v27 = vmul.f32 %v604_v1, %v861_v23  ;;  %v114_v28 = vmul.f32 %v604_v1, %v863_v24  ;;  %v123_v33 = vmul.f32 %v604_v1, %v869_v29  ;;  %v115_v34 = vmul.f32 %v604_v1, %v871_v30  ;;  %v879_v36 = vld [vmem:[#allocation5 + $0x30] sm:$0xff]  ;;  %v887_v42 = vld [vmem:[#allocation5 + $0x38] sm:$0xff]  ;;  %v603_v48 = vld [vmem:[#allocation7] ss:$0 sm:$0xff]  ;;  %p709_p4 = scmp.ne.s32.totalorder %s590_s13, %s708_s14  ;;  %p714_p6 = scmp.lt.s32.totalorder %s708_s14, %s708_s14 }
  0x52   :  { %v135_v26 = vsel %vm97_vm0, %v113_v22, 0.0  ;;  %v124_v39 = vmul.f32 %v604_v1, %v877_v35  ;;  %v116_v40 = vmul.f32 %v604_v1, %v879_v36  ;;  %v125_v45 = vmul.f32 %v604_v1, %v885_v41  ;;  %v70_v47 = vld [vmem:[#allocation2 + $0x8] sm:$0xff]  ;;  %v69_v49 = vld [vmem:[#allocation2] sm:$0xff] }
  0x53   :  { %v162_v31 = vsel %vm97_vm0, %v122_v27, 0.0  ;;  %v138_v32 = vsel %vm97_vm0, %v114_v28, 0.0  ;;  %v165_v37 = vsel %vm97_vm0, %v123_v33, 0.0  ;;  %v141_v38 = vsel %vm97_vm0, %v115_v34, 0.0  ;;  %p715_p7 = por %p714_p6, %p713_p5 }
  0x54   :  { %154 = vadd.xlane.f32.xlu1 %v153_v13  ;;  %v168_v43 = vsel %vm97_vm0, %v124_v39, 0.0  ;;  %v144_v44 = vsel %vm97_vm0, %v116_v40, 0.0  ;;  %v117_v46 = vmul.f32 %v604_v1, %v887_v42  ;;  %v171_v50 = vsel %vm97_vm0, %v125_v45, 0.0 }
  0x55   :  { %130 = vadd.xlane.f32.xlu0 %v129_v14  ;;  %v96_v52 = vmul.f32 %v603_v48, %v70_v47  ;;  %v95_v53 = vmul.f32 %v603_v48, %v69_v49  ;;  %v191_v3 = vand.u32 127, %v190_v62  ;;  %v897_v4 = vshrl.u32 %v190_v62, 7  ;;  %p716_p8 = pnand %p715_p7, %p709_p4 }
  0x56   :  { %v147_v51 = vsel %vm97_vm0, %v117_v46, 0.0  ;;  %vm264_vm5 = vcmask 1045509   ;;  %vm266_vm6 = vcmask 1046534   ;;  %vm268_vm7 = vcmask 1047559  }
  0x57   :  { %v101_v54 = vsel %vm97_vm0, %v96_v52, 0.0  ;;  %v98_v55 = vsel %vm97_vm0, %v95_v53, 0.0  ;;  %v194_v11 = vsub.s32 %v191_v3, %v897_v4  ;;  %vm287_vm8 = vcmask 64512  }
  0x58   :  { %157 = vadd.xlane.f32.xlu1 %v156_v19 }
  0x59   :  { %133 = vadd.xlane.f32.xlu0 %v132_v20 }
  0x5c   :  { %160 = vadd.xlane.f32.xlu1 %v159_v25 }
  0x5d   :  { %136 = vadd.xlane.f32.xlu0 %v135_v26 }
  0x60   :  { %163 = vadd.xlane.f32.xlu1 %v162_v31 }
  0x61   :  { %139 = vadd.xlane.f32.xlu0 %v138_v32 }
  0x64   :  { %166 = vadd.xlane.f32.xlu1 %v165_v37 }
  0x65   :  { %142 = vadd.xlane.f32.xlu0 %v141_v38 }
  0x68   :  { %169 = vadd.xlane.f32.xlu1 %v168_v43 }
  0x69   :  { %145 = vadd.xlane.f32.xlu0 %v144_v44 }
  0x6c   :  { %172 = vadd.xlane.f32.xlu1 %v171_v50 }
  0x6d   :  { %148 = vadd.xlane.f32.xlu0 %v147_v51 }
  0x70   :  { %102 = vadd.xlane.f32.xlu1 %v101_v54 }
  0x71   :  { %99 = vadd.xlane.f32.xlu0 %v98_v55 }
  0xdd   :  { %v152_v56 = vpop.xlane.xlu1 %151 }
  0xde   :  { %v128_v57 = vpop.xlane.xlu0 %127  ;;  %v227_v14 = vrot.slane %v152_v56, %v194_v11 }
  0xdf   :  { %v195_v21 = vrot.slane %v128_v57, %v194_v11 }
  0xe1   :  { %v155_v58 = vpop.xlane.xlu1 %154 }
  0xe2   :  { %v131_v59 = vpop.xlane.xlu0 %130  ;;  %v231_v15 = vrot.slane %v155_v58, %v194_v11 }
  0xe3   :  { %v199_v16 = vrot.slane %v131_v59, %v194_v11 }
  0xe4   :  { %v270_v32 = vsel %vm256_vm1, %v231_v15, %v227_v14 }
  0xe5   :  { %v158_v60 = vpop.xlane.xlu1 %157  ;;  %v257_v33 = vsel %vm256_vm1, %v199_v16, %v195_v21 }
  0xe6   :  { %v134_v61 = vpop.xlane.xlu0 %133  ;;  %v235_v19 = vrot.slane %v158_v60, %v194_v11 }
  0xe7   :  { %v203_v20 = vrot.slane %v134_v61, %v194_v11 }
  0xe8   :  { %v271_v38 = vsel %vm258_vm2, %v235_v19, %v270_v32 }
  0xe9   :  { %v161_v63 = vpop.xlane.xlu1 %160  ;;  %v259_v39 = vsel %vm258_vm2, %v203_v20, %v257_v33 }
  0xea   :  { %v137_v1 = vpop.xlane.xlu0 %136  ;;  %v239_v22 = vrot.slane %v161_v63, %v194_v11 }
  0xeb   :  { %v207_v25 = vrot.slane %v137_v1, %v194_v11 }
  0xec   :  { %v272_v44 = vsel %vm260_vm3, %v239_v22, %v271_v38 }
  0xed   :  { %v164_v7 = vpop.xlane.xlu1 %163  ;;  %v261_v45 = vsel %vm260_vm3, %v207_v25, %v259_v39  ;;  %v326_v39 = vsub.s32 2, %v897_v4 }
  0xee   :  { %v140_v8 = vpop.xlane.xlu0 %139  ;;  %v243_v26 = vrot.slane %v164_v7, %v194_v11 }
  0xef   :  { %v211_v27 = vrot.slane %v140_v8, %v194_v11 }
  0xf0   :  { %v273_v46 = vsel %vm262_vm4, %v243_v26, %v272_v44  ;;  %v333_v44 = vsub.s32 3, %v897_v4 }
  0xf1   :  { %v167_v12 = vpop.xlane.xlu1 %166  ;;  %v263_v47 = vsel %vm262_vm4, %v211_v27, %v261_v45 }
  0xf2   :  { %v143_v13 = vpop.xlane.xlu0 %142  ;;  %v247_v34 = vrot.slane %v167_v12, %v194_v11 }
  0xf3   :  { %v215_v37 = vrot.slane %v143_v13, %v194_v11 }
  0xf4   :  { %v274_v50 = vsel %vm264_vm5, %v247_v34, %v273_v46 }
  0xf5   :  { %v170_v28 = vpop.xlane.xlu1 %169  ;;  %v265_v51 = vsel %vm264_vm5, %v215_v37, %v263_v47  ;;  %v340_v47 = vsub.s32 4, %v897_v4 }
  0xf6   :  { %v146_v31 = vpop.xlane.xlu0 %145  ;;  %v251_v40 = vrot.slane %v170_v28, %v194_v11  ;;  %v319_v28 = vsub.s32 1, %v897_v4 }
  0xf7   :  { %v219_v43 = vrot.slane %v146_v31, %v194_v11  ;;  %v312_v31 = vsub.s32 0, %v897_v4 }
  0xf8   :  { %v275_v54 = vsel %vm266_vm6, %v251_v40, %v274_v50  ;;  %v347_v50 = vsub.s32 5, %v897_v4 }
  0xf9   :  { %v173_v48 = vpop.xlane.xlu1 %172  ;;  %v267_v55 = vsel %vm266_vm6, %v219_v43, %v265_v51 }
  0xfa   :  { %v149_v49 = vpop.xlane.xlu0 %148  ;;  %v255_v52 = vrot.slane %v173_v48, %v194_v11 }
  0xfb   :  { %v223_v53 = vrot.slane %v149_v49, %v194_v11 }
  0xfc   :  { %v276_v56 = vsel %vm268_vm7, %v255_v52, %v275_v54 }
  0xfd   :  { %v269_v57 = vsel %vm268_vm7, %v223_v53, %v267_v55  ;;  %v103_v58 = vpop.xlane.xlu1 %102  ;;  %v354_v53 = vsub.s32 6, %v897_v4 }
  0xfe   :  { %v100_v59 = vpop.xlane.xlu0 %99  ;;  %v280_v60 = vadd.f32 %v276_v56, %v103_v58  ;;  %v361_v56 = vsub.s32 7, %v897_v4 }
  0xff   :  { %v279_v61 = vadd.f32 %v269_v57, %v100_v59 }
 0x100   :  { %v284_v62 = vmul.f32 0.01, %v280_v60  ;;  %vm282_vm9 = vcmp.ge.f32.partialorder %v280_v60, 0.0 }
 0x101   :  { %v283_v63 = vmul.f32 0.01, %v279_v61  ;;  %vm281_vm10 = vcmp.ge.f32.partialorder %v279_v61, 0.0 }
 0x102   :  { %v286_v1 = vsel %vm282_vm9, %v280_v60, %v284_v62 }
 0x103   :  { %v285_v3 = vsel %vm281_vm10, %v279_v61, %v283_v63  ;;  %v291_v7 = vsel %vm287_vm8, %v286_v1, -inf }
 0x104   :  { %v288_v8 = vsel %vm287_vm8, %v285_v3, -inf  ;;  %292 = vmax.xlane.f32.xlu1 %v291_v7 }
 0x105   :  { %289 = vmax.xlane.f32.xlu0 %v288_v8 }
 0x191   :  { %v293_v11 = vpop.xlane.xlu1 %292 }
 0x192   :  { %v290_v12 = vpop.xlane.xlu0 %289  ;;  %v295_v13 = vsub.f32 %v286_v1, %v293_v11 }
 0x193   :  { %v294_v14 = vsub.f32 %v285_v3, %v290_v12 }
 0x194   :  { %v298_v15 = vmul.f32 1.442695, %v295_v13 }
 0x195   :  { %v296_v16 = vmul.f32 1.442695, %v294_v14 }
 0x196   :  { %612 = vpow2.f32 %v298_v15 }
 0x197   :  { %614 = vpow2.f32 %v296_v16 }
 0x1a0   :  { %v613_v19 = vpop.eup %612 }
 0x1a1   :  { %v615_v20 = vpop.eup %614  ;;  %v303_v21 = vsel %vm287_vm8, %v613_v19, 0.0 }
 0x1a2   :  { %304 = vadd.xlane.f32.xlu1 %v303_v21  ;;  %v300_v22 = vsel %vm287_vm8, %v615_v20, 0.0 }
 0x1a3   :  { %301 = vadd.xlane.f32.xlu0 %v300_v22 }
 0x22f   :  { %v305_v25 = vpop.xlane.xlu1 %304 }
 0x230   :  { %616 = vrcp.f32 %v305_v25  ;;  %v302_v26 = vpop.xlane.xlu0 %301 }
 0x231   :  { %618 = vrcp.f32 %v302_v26 }
 0x23a   :  { %v617_v27 = vpop.eup %616 }
 0x23b   :  { %v619_v32 = vpop.eup %618  ;;  %v309_v34 = vmul.f32 %v617_v27, %v613_v19 }
 0x23c   :  { %v308_v33 = vmul.f32 %v619_v32, %v615_v20 }
 0x23d   :  { %v369_v40 = vrot.slane %v309_v34, %v312_v31  ;;  %v376_v45 = vrot.slane %v309_v34, %v319_v28  ;;  %v383_v48 = vrot.slane %v309_v34, %v326_v39  ;;  %v390_v51 = vrot.slane %v309_v34, %v333_v44 }
 0x23e   :  { %v320_v37 = vrot.slane %v308_v33, %v319_v28  ;;  %v313_v38 = vrot.slane %v308_v33, %v312_v31  ;;  %v327_v43 = vrot.slane %v308_v33, %v326_v39  ;;  %v334_v46 = vrot.slane %v308_v33, %v333_v44 }
 0x23f   :  { %v341_v49 = vrot.slane %v308_v33, %v340_v47  ;;  %v348_v52 = vrot.slane %v308_v33, %v347_v50  ;;  %v397_v54 = vrot.slane %v309_v34, %v340_v47  ;;  %v355_v55 = vrot.slane %v308_v33, %v354_v53 }
 0x240   :  { %322 = vbcast.lane.b32.xlu1 %v320_v37, 256  ;;  %315 = vbcast.lane.b32.xlu0 %v313_v38, 256  ;;  %v404_v57 = vrot.slane %v309_v34, %v347_v50  ;;  %v362_v58 = vrot.slane %v308_v33, %v361_v56  ;;  %v411_v59 = vrot.slane %v309_v34, %v354_v53 }
 0x241   :  { %v418_v60 = vrot.slane %v309_v34, %v361_v56 }
 0x244   :  { %371 = vbcast.lane.b32.xlu1 %v369_v40, 256  ;;  %329 = vbcast.lane.b32.xlu0 %v327_v43, 256 }
 0x248   :  { %378 = vbcast.lane.b32.xlu1 %v376_v45, 256  ;;  %336 = vbcast.lane.b32.xlu0 %v334_v46, 256 }
 0x24c   :  { %385 = vbcast.lane.b32.xlu1 %v383_v48, 256  ;;  %343 = vbcast.lane.b32.xlu0 %v341_v49, 256 }
 0x250   :  { %392 = vbcast.lane.b32.xlu1 %v390_v51, 256  ;;  %350 = vbcast.lane.b32.xlu0 %v348_v52, 256 }
 0x254   :  { %399 = vbcast.lane.b32.xlu1 %v397_v54, 256  ;;  %357 = vbcast.lane.b32.xlu0 %v355_v55, 256 }
 0x258   :  { %406 = vbcast.lane.b32.xlu1 %v404_v57, 256  ;;  %364 = vbcast.lane.b32.xlu0 %v362_v58, 256 }
 0x25c   :  { %413 = vbcast.lane.b32.xlu1 %v411_v59, 256 }
 0x260   :  { %420 = vbcast.lane.b32.xlu1 %v418_v60, 256 }
 0x2b2   :  { %v323_v61 = vpop.permute.xlu1 %322  ;;  %v316_v62 = vpop.permute.xlu0 %315 }
 0x2b3   :  { %v423_v63 = vmul.f32 %v323_v61, %v839_v6  ;;  %v422_v1 = vmul.f32 %v316_v62, %v833_v2 }
 0x2b5   :  { %v445_v3 = vsel %vm97_vm0, %v423_v63, 0.0  ;;  %v438_v4 = vsel %vm97_vm0, %v422_v1, 0.0 }
 0x2b6   :  { %v446_v7 = vrot.slane %v445_v3, 4  ;;  %v439_v8 = vrot.slane %v438_v4, 4  ;;  %v372_v11 = vpop.permute.xlu1 %371  ;;  %v330_v12 = vpop.permute.xlu0 %329 }
 0x2b7   :  { %v430_v13 = vmul.f32 %v372_v11, %v831_v0  ;;  %v424_v14 = vmul.f32 %v330_v12, %v845_v10 }
 0x2b8   :  { %v447_v15 = vadd.f32 %v446_v7, %v445_v3  ;;  %v440_v16 = vadd.f32 %v439_v8, %v438_v4 }
 0x2b9   :  { %v494_v19 = vsel %vm97_vm0, %v430_v13, 0.0  ;;  %v452_v6 = vsel %vm97_vm0, %v424_v14, 0.0 }
 0x2ba   :  { %v448_v20 = vrot.slane %v447_v15, 2  ;;  %v379_v2 = vpop.permute.xlu1 %378  ;;  %v337_v21 = vpop.permute.xlu0 %336  ;;  %v441_v22 = vrot.slane %v440_v16, 2  ;;  %v453_v25 = vrot.slane %v452_v6, 4  ;;  %v495_v28 = vrot.slane %v494_v19, 4 }
 0x2bb   :  { %v431_v26 = vmul.f32 %v379_v2, %v837_v5  ;;  %v425_v27 = vmul.f32 %v337_v21, %v855_v18 }
 0x2bc   :  { %v449_v31 = vadd.f32 %v448_v20, %v447_v15  ;;  %v442_v34 = vadd.f32 %v441_v22, %v440_v16  ;;  %v454_v37 = vadd.f32 %v453_v25, %v452_v6  ;;  %v496_v40 = vadd.f32 %v495_v28, %v494_v19 }
 0x2bd   :  { %v501_v0 = vsel %vm97_vm0, %v431_v26, 0.0  ;;  %v459_v10 = vsel %vm97_vm0, %v425_v27, 0.0 }
 0x2be   :  { %v386_v32 = vpop.permute.xlu1 %385  ;;  %v344_v33 = vpop.permute.xlu0 %343  ;;  %v502_v43 = vrot.slane %v501_v0, 4  ;;  %v460_v44 = vrot.slane %v459_v10, 4  ;;  %v450_v18 = vrot.slane %v449_v31, 1  ;;  %v443_v48 = vrot.slane %v442_v34, 1 }
 0x2bf   :  { %v432_v38 = vmul.f32 %v386_v32, %v843_v9  ;;  %v426_v39 = vmul.f32 %v344_v33, %v863_v24  ;;  %v455_v49 = vrot.slane %v454_v37, 2  ;;  %v497_v52 = vrot.slane %v496_v40, 2 }
 0x2c0   :  { %v503_v53 = vadd.f32 %v502_v43, %v501_v0  ;;  %v461_v24 = vadd.f32 %v460_v44, %v459_v10  ;;  %v451_v61 = vadd.f32 %v450_v18, %v449_v31  ;;  %v444_v62 = vadd.f32 %v443_v48, %v442_v34 }
 0x2c1   :  { %v466_v5 = vsel %vm97_vm0, %v426_v39, 0.0  ;;  %v508_v45 = vsel %vm97_vm0, %v432_v38, 0.0  ;;  %v456_v63 = vadd.f32 %v455_v49, %v454_v37  ;;  %v946_v3 = vadd.f32 %v497_v52, %v496_v40 }
 0x2c2   :  { %v393_v46 = vpop.permute.xlu1 %392  ;;  %v351_v47 = vpop.permute.xlu0 %350  ;;  %v467_v50 = vrot.slane %v466_v5, 4  ;;  %v509_v54 = vrot.slane %v508_v45, 4  ;;  %v462_v7 = vrot.slane %v461_v24, 2  ;;  %v566_v6 = vsel %vm256_vm1, %v451_v61, %v444_v62 }
 0x2c3   :  { %v433_v51 = vmul.f32 %v393_v46, %v853_v17  ;;  %v427_v9 = vmul.f32 %v351_v47, %v871_v30  ;;  %v504_v17 = vrot.slane %v503_v53, 2  ;;  %v457_v20 = vrot.slane %v456_v63, 1 }
 0x2c4   :  { %v468_v56 = vadd.f32 %v467_v50, %v466_v5  ;;  %v510_v8 = vadd.f32 %v509_v54, %v508_v45  ;;  %v499_v21 = vrot.slane %v946_v3, 1  ;;  %v463_v25 = vadd.f32 %v462_v7, %v461_v24 }
 0x2c5   :  { %v515_v55 = vsel %vm97_vm0, %v433_v51, 0.0  ;;  %v473_v58 = vsel %vm97_vm0, %v427_v9, 0.0  ;;  %v458_v34 = vadd.f32 %v457_v20, %v456_v63 }
 0x2c6   :  { %v516_v57 = vrot.slane %v515_v55, 4  ;;  %v400_v59 = vpop.permute.xlu1 %399  ;;  %v358_v60 = vpop.permute.xlu0 %357  ;;  %v474_v1 = vrot.slane %v473_v58, 4  ;;  %v469_v12 = vrot.slane %v468_v56, 2  ;;  %v511_v26 = vrot.slane %v510_v8, 2 }
 0x2c7   :  { %v434_v4 = vmul.f32 %v400_v59, %v861_v23  ;;  %v428_v30 = vmul.f32 %v358_v60, %v879_v36  ;;  %v505_v23 = vadd.f32 %v504_v17, %v503_v53  ;;  %v464_v18 = vrot.slane %v463_v25, 1 }
 0x2c8   :  { %v475_v11 = vadd.f32 %v474_v1, %v473_v58  ;;  %v517_v13 = vadd.f32 %v516_v57, %v515_v55  ;;  %v470_v0 = vadd.f32 %v469_v12, %v468_v56  ;;  %v512_v45 = vadd.f32 %v511_v26, %v510_v8 }
 0x2c9   :  { %v522_v14 = vsel %vm97_vm0, %v434_v4, 0.0  ;;  %v480_v15 = vsel %vm97_vm0, %v428_v30, 0.0  ;;  %v506_v40 = vrot.slane %v505_v23, 1  ;;  %v567_v57 = vsel %vm258_vm2, %v458_v34, %v566_v6 }
 0x2ca   :  { %v407_v16 = vpop.permute.xlu1 %406  ;;  %v365_v19 = vpop.permute.xlu0 %364  ;;  %v476_v2 = vrot.slane %v475_v11, 2  ;;  %v523_v22 = vrot.slane %v522_v14, 4  ;;  %v481_v36 = vrot.slane %v480_v15, 4  ;;  %v518_v31 = vrot.slane %v517_v13, 2 }
 0x2cb   :  { %v435_v27 = vmul.f32 %v407_v16, %v869_v29  ;;  %v429_v28 = vmul.f32 %v365_v19, %v887_v42  ;;  %v471_v46 = vrot.slane %v470_v0, 1  ;;  %v465_v58 = vadd.f32 %v464_v18, %v463_v25 }
 0x2cc   :  { %v524_v10 = vadd.f32 %v523_v22, %v522_v14  ;;  %v482_v32 = vadd.f32 %v481_v36, %v480_v15  ;;  %v477_v37 = vadd.f32 %v476_v2, %v475_v11  ;;  %v519_v47 = vadd.f32 %v518_v31, %v517_v13 }
 0x2cd   :  { %v529_v38 = vsel %vm97_vm0, %v435_v27, 0.0  ;;  %v487_v39 = vsel %vm97_vm0, %v429_v28, 0.0  ;;  %v513_v60 = vrot.slane %v512_v45, 1  ;;  %v472_v61 = vadd.f32 %v471_v46, %v470_v0 }
 0x2ce   :  { %v414_v33 = vpop.permute.xlu1 %413  ;;  %v525_v43 = vrot.slane %v524_v10, 2  ;;  %v483_v44 = vrot.slane %v482_v32, 2  ;;  %v530_v5 = vrot.slane %v529_v38, 4  ;;  %v488_v29 = vrot.slane %v487_v39, 4 }
 0x2cf   :  { %v436_v42 = vmul.f32 %v414_v33, %v877_v35  ;;  %v478_v51 = vrot.slane %v477_v37, 1  ;;  %v520_v1 = vrot.slane %v519_v47, 1  ;;  %v507_v7 = vadd.f32 %v506_v40, %v505_v23 }
 0x2d0   :  { %v484_v48 = vadd.f32 %v483_v44, %v482_v32  ;;  %v531_v49 = vadd.f32 %v530_v5, %v529_v38  ;;  %v489_v52 = vadd.f32 %v488_v29, %v487_v39  ;;  %v526_v24 = vadd.f32 %v525_v43, %v524_v10 }
 0x2d1   :  { %v536_v53 = vsel %vm97_vm0, %v436_v42, 0.0  ;;  %v479_v17 = vadd.f32 %v478_v51, %v477_v37  ;;  %v568_v12 = vsel %vm260_vm3, %v465_v58, %v567_v57  ;;  %v500_v16 = vadd.f32 %v499_v21, %v946_v3 }
 0x2d2   :  { %v421_v50 = vpop.permute.xlu1 %420  ;;  %v485_v54 = vrot.slane %v484_v48, 1  ;;  %v532_v55 = vrot.slane %v531_v49, 2  ;;  %v537_v56 = vrot.slane %v536_v53, 4  ;;  %v490_v59 = vrot.slane %v489_v52, 2 }
 0x2d3   :  { %v437_v9 = vmul.f32 %v421_v50, %v885_v41  ;;  %v527_v41 = vrot.slane %v526_v24, 1  ;;  %v514_v19 = vadd.f32 %v513_v60, %v512_v45  ;;  %v569_v6 = vsel %vm262_vm4, %v472_v61, %v568_v12 }
 0x2d4   :  { %v533_v62 = vadd.f32 %v532_v55, %v531_v49  ;;  %v538_v63 = vadd.f32 %v537_v56, %v536_v53  ;;  %v491_v4 = vadd.f32 %v490_v59, %v489_v52  ;;  %v486_v8 = vadd.f32 %v485_v54, %v484_v48 }
 0x2d5   :  { %v543_v35 = vsel %vm97_vm0, %v437_v9, 0.0  ;;  %v521_v2 = vadd.f32 %v520_v1, %v519_v47  ;;  %v570_v25 = vsel %vm264_vm5, %v479_v17, %v569_v6  ;;  %v528_v23 = vadd.f32 %v527_v41, %v526_v24 }
 0x2d6   :  { %v544_v30 = vrot.slane %v543_v35, 4  ;;  %v539_v11 = vrot.slane %v538_v63, 2  ;;  %v534_v13 = vrot.slane %v533_v62, 1  ;;  %v492_v14 = vrot.slane %v491_v4, 1 }
 0x2d7   :  { %v571_v27 = vsel %vm266_vm6, %v486_v8, %v570_v25  ;;  %v573_v28 = vsel %vm256_vm1, %v507_v7, %v500_v16 }
 0x2d8   :  { %v545_v15 = vadd.f32 %v544_v30, %v543_v35  ;;  %v540_v20 = vadd.f32 %v539_v11, %v538_v63  ;;  %v493_v22 = vadd.f32 %v492_v14, %v491_v4  ;;  %v535_v0 = vadd.f32 %v534_v13, %v533_v62 }
 0x2d9   :  { %v574_v3 = vsel %vm258_vm2, %v514_v19, %v573_v28 }
 0x2da   :  { %v546_v36 = vrot.slane %v545_v15, 2  ;;  %v541_v26 = vrot.slane %v540_v20, 1  ;;  %v572_v10 = vsel %vm268_vm7, %v493_v22, %v571_v27  ;;  %v575_v32 = vsel %vm260_vm3, %v521_v2, %v574_v3 }
 0x2db   :  { %582 = vst.msk [vmem:[#allocation10] sm:$0xff] %vm97_vm0, %v572_v10  ;;  %v576_v34 = vsel %vm262_vm4, %v528_v23, %v575_v32 }
 0x2dc   :  { %v547_v31 = vadd.f32 %v546_v36, %v545_v15  ;;  %v542_v21 = vadd.f32 %v541_v26, %v540_v20  ;;  %v577_v38 = vsel %vm264_vm5, %v535_v0, %v576_v34 }
 0x2de   :  { %v548_v33 = vrot.slane %v547_v31, 1  ;;  %v578_v39 = vsel %vm266_vm6, %v542_v21, %v577_v38 }
 0x2e0   :  { %v549_v37 = vadd.f32 %v548_v33, %v547_v31 }
 0x2e2   :  { %v579_v40 = vsel %vm268_vm7, %v549_v37, %v578_v39 }
 0x2e3   :  { %583 = vst.msk [vmem:[#allocation10 + $0x8] sm:$0xff] %vm97_vm0, %v579_v40 }
 0x2e4   :  { %719 = shalt.err (!%p716_p8)
}
 0x2e5   :  { %s720_s17 = scalar_lea.hbm %s997_s4, 256 }
 0x2e6   :  { %p721_p9 = scmp.ne.s32.totalorder %s997_s4, %s720_s17  ;;  %p724_p10 = scmp.lt.u32.totalorder %s720_s17, %s997_s4 }
 0x2e8   :  { %p726_p11 = pnand %p724_p10, %p721_p9 }
 0x2ea   :  { %729 = shalt.err (!%p726_p11)
}
 0x2eb   :  { %595 = dma.vmem_to_hbm [thread:$0]  %s590_s13, 256, %s997_s4, [#allocation4], %s740_s27, %s740_s27, %s741_s28  }
 0x2ec   :  { %736 = dma.done.wait [#allocation4], 256  }
 0x2ed   :  { %737 = vsyncadd [#allocation4], 4294967040 }
 0x2ee   :  { %599 = vsyncpa [#allocation3], 1 }
 0x2ef   :  { %600 = vsyncpa [#allocation6], 1 }
 0x2f0   :  { %601 = vsyncpa [#allocation9], 1 }
 0x2f1   :  { %602 = vsyncpa [#allocation4], 1 }

</bundles_post_ra>
